<compile_context>
chip_gen: v5e
topology: v5e:2x2
jax: 0.10.0
libtpu: 0.0.40
codegen_flags: <defaults>
</compile_context>

<pallas_src>
import jax
import jax.numpy as jnp
from jax.experimental import pallas as pl
from jax.experimental.pallas import tpu as pltpu


# ----------------------------------------------------------------------------
# tiling helpers
# ----------------------------------------------------------------------------
_ROW_TILE_CAP = 512                    # good v5e/v6e/v7x default (perf review)
_TILE_BYTE_BUDGET = 8 * 1024 * 1024    # per input buffer (x2 for double-buffer)
_VMEM_LIMIT_BYTES = 48 * 1024 * 1024   # <= physical VMEM on v5e/v6e/v7x


def _round_up(x, m):
    return ((x + m - 1) // m) * m


def _row_tile(n, f):
    """Rows per grid step: multiple of 8, capped by 512 and a VMEM byte budget."""
    by_budget = max(8, (_TILE_BYTE_BUDGET // (f * 4)) // 8 * 8)
    return max(8, min(_ROW_TILE_CAP, by_budget, _round_up(n, 8)))


def _pad_rows(x, tile_n):
    n = x.shape[0]
    n_pad = _round_up(n, tile_n)
    if n_pad != n:
        x = jnp.pad(x, ((0, n_pad - n), (0, 0)))
    return x


# ----------------------------------------------------------------------------
# Kernel 1: fused column stats + Gram matrix, single pass over raw X
#   colsum   += sum_r x[r, :]
#   colsumsq += sum_r x[r, :]^2
#   gram     += X_tile^T X_tile          (MXU)
# Outputs use constant index_maps -> VMEM-resident accumulators across the
# (reduction / "arbitrary") row-tile grid, written back once at the end.
# ----------------------------------------------------------------------------
def _stats_gram_kernel(x_ref, colsum_ref, colsumsq_ref, gram_ref):
    @pl.when(pl.program_id(0) == 0)
    def _init():
        colsum_ref[...] = jnp.zeros_like(colsum_ref)
        colsumsq_ref[...] = jnp.zeros_like(colsumsq_ref)
        gram_ref[...] = jnp.zeros_like(gram_ref)

    x = x_ref[...]
    colsum_ref[...] += jnp.sum(x, axis=0, keepdims=True)
    colsumsq_ref[...] += jnp.sum(x * x, axis=0, keepdims=True)
    # X^T X without materializing a transpose: contract over the row axis.
    gram_ref[...] += jax.lax.dot_general(
        x, x, (((0,), (0,)), ((), ())), preferred_element_type=jnp.float32
    )


def stats_gram(x):
    """Returns (colsum (1,F), colsumsq (1,F), gram (F,F)) of x, one HBM pass."""
    x = x.astype(jnp.float32)
    n, f = x.shape
    tile_n = _row_tile(n, f)
    x_p = _pad_rows(x, tile_n)          # zero rows are neutral for all 3 sums
    grid = (x_p.shape[0] // tile_n,)
    # NOTE: the (F, F) Gram accumulator lives in VMEM; fine for the modest
    # feature dims this embedding module targets (F up to ~1-2K).
    return pl.pallas_call(
        _stats_gram_kernel,
        out_shape=(
            jax.ShapeDtypeStruct((1, f), jnp.float32),
            jax.ShapeDtypeStruct((1, f), jnp.float32),
            jax.ShapeDtypeStruct((f, f), jnp.float32),
        ),
        grid_spec=pltpu.PrefetchScalarGridSpec(
            num_scalar_prefetch=0,
            grid=grid,
            in_specs=[pl.BlockSpec((tile_n, f), lambda i: (i, 0))],
            out_specs=(
                pl.BlockSpec((1, f), lambda i: (0, 0)),
                pl.BlockSpec((1, f), lambda i: (0, 0)),
                pl.BlockSpec((f, f), lambda i: (0, 0)),
            ),
        ),
        compiler_params=pltpu.CompilerParams(
            dimension_semantics=("arbitrary",),
            vmem_limit_bytes=_VMEM_LIMIT_BYTES,
        ),
    )(x_p)


# ----------------------------------------------------------------------------
# Kernel 2: projection matmul, row-tiled, lane-padded output
#   x tile (TILE_N, F) streams; V tile (F, 128) is VMEM-resident (index_map
#   constant); output block (TILE_N, 128) is lane-dense -> unmasked stores.
# ----------------------------------------------------------------------------
def _project_kernel(x_ref, v_ref, o_ref):
    o_ref[...] = jnp.dot(
        x_ref[...], v_ref[...], preferred_element_type=jnp.float32
    )


def project(x, v_pad):
    x = x.astype(jnp.float32)
    n, f = x.shape
    k_pad = v_pad.shape[1]
    tile_n = _row_tile(n, f)
    x_p = _pad_rows(x, tile_n)
    grid = (x_p.shape[0] // tile_n,)
    out = pl.pallas_call(
        _project_kernel,
        out_shape=jax.ShapeDtypeStruct((x_p.shape[0], k_pad), jnp.float32),
        grid_spec=pltpu.PrefetchScalarGridSpec(
            num_scalar_prefetch=0,
            grid=grid,
            in_specs=[
                pl.BlockSpec((tile_n, f), lambda i: (i, 0)),
                # weight is reused by every row tile: constant index_map keeps
                # it VMEM-resident (DMA'd once).
                pl.BlockSpec((f, k_pad), lambda i: (0, 0)),
            ],
            out_specs=pl.BlockSpec((tile_n, k_pad), lambda i: (i, 0)),
        ),
        compiler_params=pltpu.CompilerParams(
            dimension_semantics=("parallel",),
            vmem_limit_bytes=_VMEM_LIMIT_BYTES,
        ),
    )(x_p, v_pad)
    return out[:n]  # drop padded rows; caller slices the lane padding


# ----------------------------------------------------------------------------
# SVDTorch forward (method='naive')
# ----------------------------------------------------------------------------
def _standardized_gram(colsum, colsumsq, gram, n_rows):
    """Form G_std = D^-1 (X^T X - n mu mu^T) D^-1 from streamed statistics."""
    n = jnp.float32(n_rows)
    mu = colsum[0] / n                                     # (F,)
    denom = jnp.maximum(n - 1.0, 1.0)                      # guard n == 1
    var = jnp.maximum(colsumsq[0] - n * mu * mu, 0.0) / denom
    dinv = 1.0 / (jnp.sqrt(var) + jnp.float32(1e-4))       # (F,)
    g = (gram - n * jnp.outer(mu, mu)) * dinv[:, None] * dinv[None, :]
    return 0.5 * (g + g.T)                                 # enforce symmetry


def svd_fit(support, query):
    """fit() on the (virtual) concat of support+query without materializing it."""
    cs_s, ss_s, g_s = stats_gram(support)
    cs_q, ss_q, g_q = stats_gram(query)
    n_total = support.shape[0] + query.shape[0]
    g_std = _standardized_gram(cs_s + cs_q, ss_s + ss_q, g_s + g_q, n_total)
    # TODO(synk): eigen-decomposition has no Pallas equivalent; eigh on the tiny
    # (F, F) Gram replaces torch.svd (U is never used; V matches up to column sign).
    evals, evecs = jnp.linalg.eigh(g_std)
    d = jnp.sqrt(jnp.maximum(evals, 0.0))   # singular values of standardized X
    return d, evecs


def svd_forward(support_vector, query_vector, n_components=2):
    support_vector = support_vector.astype(jnp.float32)
    query_vector = query_vector.astype(jnp.float32)

    d, v = svd_fit(support_vector, query_vector)

    # pick columns of V for the largest |singular values|
    pick = jnp.argsort(-jnp.abs(d))[:n_components]
    v_sel = jnp.take(v, pick, axis=1)                      # (F, k)

    # lane-pad V to a multiple of 128 columns -> lane-dense projection output
    f = v_sel.shape[0]
    k_pad = _round_up(max(n_components, 1), 128)
    v_pad = jnp.zeros((f, k_pad), jnp.float32).at[:, :n_components].set(v_sel)

    # project the RAW (unstandardized) data, matching the torch reference;
    # support and query are projected separately -> no concat in HBM.
    support_embedding = project(support_vector, v_pad)[:, :n_components]
    query_embedding = project(query_vector, v_pad)[:, :n_components]
    return support_embedding, query_embedding


if __name__ == "__main__":
    key = jax.random.PRNGKey(0)
    k_s, k_q = jax.random.split(key)

    n_support, n_query, n_features = 6, 2, 32
    support_vector = jax.random.normal(k_s, (n_support, n_features), dtype=jnp.float32)
    query_vector = jax.random.normal(k_q, (n_query, n_features), dtype=jnp.float32)

    support_emb, query_emb = svd_forward(support_vector, query_vector, n_components=2)
    jax.block_until_ready((support_emb, query_emb))

    assert support_emb.shape == (n_support, 2)
    assert query_emb.shape == (n_query, 2)
    assert bool(jnp.all(jnp.isfinite(support_emb)))
    assert bool(jnp.all(jnp.isfinite(query_emb)))

    # Pure-JAX reference mirroring the torch semantics.  V columns are defined
    # only up to sign (both in torch.svd and here), so compare sign-invariantly.
    concat = jnp.concatenate((support_vector, query_vector), axis=0)
    mu = jnp.mean(concat, axis=0, keepdims=True)
    sd = jnp.std(concat, axis=0, keepdims=True, ddof=1)
    x_std = (concat - mu) / (sd + 1e-4)
    _, d_ref, vt_ref = jnp.linalg.svd(x_std, full_matrices=False)
    v_ref = vt_ref.T
    pick_ref = jnp.argsort(-jnp.abs(d_ref))[:2]
    emb_ref = concat @ v_ref[:, pick_ref]
    emb = jnp.concatenate((support_emb, query_emb), axis=0)
    for c in range(2):
        a, b = emb[:, c], emb_ref[:, c]
        err = float(jnp.minimum(jnp.linalg.norm(a - b), jnp.linalg.norm(a + b)))
        assert err <= 1e-2 * max(1.0, float(jnp.linalg.norm(b))), err

    print("KERNEL_OK")
</pallas_src>

<mosaic_0001>
module attributes {stable_mosaic.version = 11 : i64} {
  func.func @_stats_gram_kernel(%arg0: i32, %arg1: memref<8x32xf32, #tpu.memory_space<vmem>>, %arg2: memref<1x32xf32, #tpu.memory_space<vmem>>, %arg3: memref<1x32xf32, #tpu.memory_space<vmem>>, %arg4: memref<32x32xf32, #tpu.memory_space<vmem>>) attributes {dimension_semantics = [#tpu.dimension_semantics<arbitrary>], iteration_bounds = array<i64: 1>, scalar_prefetch = 0 : i64, scratch_operands = 0 : i64, tpu.core_type = #tpu.core_type<tc>, window_params = [{transform_indices = @transform_0, window_bounds = array<i64: 8, 32>}, {pipeline_mode = #tpu.pipeline_mode<synchronous>, transform_indices = @transform_1, window_bounds = array<i64: 1, 32>}, {pipeline_mode = #tpu.pipeline_mode<synchronous>, transform_indices = @transform_2, window_bounds = array<i64: 1, 32>}, {pipeline_mode = #tpu.pipeline_mode<synchronous>, transform_indices = @transform_3, window_bounds = array<i64: 32, 32>}]} {
    %c0_i32 = arith.constant 0 : i32
    %0 = arith.cmpi eq, %arg0, %c0_i32 : i32
    %1 = arith.extui %0 : i1 to i32
    %c0_i32_0 = arith.constant 0 : i32
    %2 = arith.cmpi ne, %1, %c0_i32_0 : i32
    scf.if %2 {
      %cst_16 = arith.constant 0.000000e+00 : f32
      %19 = vector.broadcast %cst_16 : f32 to vector<1x32xf32>
      %c0_17 = arith.constant 0 : index
      %c0_18 = arith.constant 0 : index
      %20 = vector.load %arg2[%c0_17, %c0_18] : memref<1x32xf32, #tpu.memory_space<vmem>>, vector<1x32xf32>
      tpu.vector_store %arg2[%c0_17, %c0_18], %19 {strides = array<i32>} : memref<1x32xf32, #tpu.memory_space<vmem>>, vector<1x32xf32>,
      %cst_19 = arith.constant 0.000000e+00 : f32
      %21 = vector.broadcast %cst_19 : f32 to vector<1x32xf32>
      %c0_20 = arith.constant 0 : index
      %c0_21 = arith.constant 0 : index
      %22 = vector.load %arg3[%c0_20, %c0_21] : memref<1x32xf32, #tpu.memory_space<vmem>>, vector<1x32xf32>
      tpu.vector_store %arg3[%c0_20, %c0_21], %21 {strides = array<i32>} : memref<1x32xf32, #tpu.memory_space<vmem>>, vector<1x32xf32>,
      %cst_22 = arith.constant 0.000000e+00 : f32
      %23 = vector.broadcast %cst_22 : f32 to vector<32x32xf32>
      %c0_23 = arith.constant 0 : index
      %c0_24 = arith.constant 0 : index
      %24 = vector.load %arg4[%c0_23, %c0_24] : memref<32x32xf32, #tpu.memory_space<vmem>>, vector<32x32xf32>
      tpu.vector_store %arg4[%c0_23, %c0_24], %23 {strides = array<i32>} : memref<32x32xf32, #tpu.memory_space<vmem>>, vector<32x32xf32>,
    } else {
    }
    %c0 = arith.constant 0 : index
    %c0_1 = arith.constant 0 : index
    %3 = vector.load %arg1[%c0, %c0_1] : memref<8x32xf32, #tpu.memory_space<vmem>>, vector<8x32xf32>
    %c0_2 = arith.constant 0 : index
    %c0_3 = arith.constant 0 : index
    %4 = vector.load %arg2[%c0_2, %c0_3] : memref<1x32xf32, #tpu.memory_space<vmem>>, vector<1x32xf32>
    %cst = arith.constant dense<0.000000e+00> : vector<32xf32>
    %5 = vector.multi_reduction <add>, %3, %cst [0] : vector<8x32xf32> to vector<32xf32>
    %6 = vector.shape_cast %5 : vector<32xf32> to vector<1x32xf32>
    %7 = arith.addf %4, %6 : vector<1x32xf32>
    %c0_4 = arith.constant 0 : index
    %c0_5 = arith.constant 0 : index
    %8 = vector.load %arg2[%c0_4, %c0_5] : memref<1x32xf32, #tpu.memory_space<vmem>>, vector<1x32xf32>
    tpu.vector_store %arg2[%c0_4, %c0_5], %7 {strides = array<i32>} : memref<1x32xf32, #tpu.memory_space<vmem>>, vector<1x32xf32>,
    %c0_6 = arith.constant 0 : index
    %c0_7 = arith.constant 0 : index
    %9 = vector.load %arg3[%c0_6, %c0_7] : memref<1x32xf32, #tpu.memory_space<vmem>>, vector<1x32xf32>
    %10 = arith.mulf %3, %3 : vector<8x32xf32>
    %cst_8 = arith.constant dense<0.000000e+00> : vector<32xf32>
    %11 = vector.multi_reduction <add>, %10, %cst_8 [0] : vector<8x32xf32> to vector<32xf32>
    %12 = vector.shape_cast %11 : vector<32xf32> to vector<1x32xf32>
    %13 = arith.addf %9, %12 : vector<1x32xf32>
    %c0_9 = arith.constant 0 : index
    %c0_10 = arith.constant 0 : index
    %14 = vector.load %arg3[%c0_9, %c0_10] : memref<1x32xf32, #tpu.memory_space<vmem>>, vector<1x32xf32>
    tpu.vector_store %arg3[%c0_9, %c0_10], %13 {strides = array<i32>} : memref<1x32xf32, #tpu.memory_space<vmem>>, vector<1x32xf32>,
    %c0_11 = arith.constant 0 : index
    %c0_12 = arith.constant 0 : index
    %15 = vector.load %arg4[%c0_11, %c0_12] : memref<32x32xf32, #tpu.memory_space<vmem>>, vector<32x32xf32>
    %cst_13 = arith.constant dense<0.000000e+00> : vector<32x32xf32>
    %16 = tpu.matmul %3, %3, %cst_13 {dimension_numbers = #tpu.dot_dimension_numbers<[0], [0], [1], [1], [0, 1, 1, 1], [], []>} : vector<8x32xf32>, vector<8x32xf32>, vector<32x32xf32> -> vector<32x32xf32>
    %17 = arith.addf %15, %16 : vector<32x32xf32>
    %c0_14 = arith.constant 0 : index
    %c0_15 = arith.constant 0 : index
    %18 = vector.load %arg4[%c0_14, %c0_15] : memref<32x32xf32, #tpu.memory_space<vmem>>, vector<32x32xf32>
    tpu.vector_store %arg4[%c0_14, %c0_15], %17 {strides = array<i32>} : memref<32x32xf32, #tpu.memory_space<vmem>>, vector<32x32xf32>,
    return
  }
  func.func @transform_0(%arg0: i32) -> (i32, i32) {
    %c0_i32 = arith.constant 0 : i32
    %c0_i32_0 = arith.constant 0 : i32
    return %arg0, %c0_i32 : i32, i32
  }
  func.func @transform_1(%arg0: i32) -> (i32, i32) {
    %c0_i32 = arith.constant 0 : i32
    %c0_i32_0 = arith.constant 0 : i32
    %c0_i32_1 = arith.constant 0 : i32
    return %c0_i32, %c0_i32_0 : i32, i32
  }
  func.func @transform_2(%arg0: i32) -> (i32, i32) {
    %c0_i32 = arith.constant 0 : i32
    %c0_i32_0 = arith.constant 0 : i32
    %c0_i32_1 = arith.constant 0 : i32
    return %c0_i32, %c0_i32_0 : i32, i32
  }
  func.func @transform_3(%arg0: i32) -> (i32, i32) {
    %c0_i32 = arith.constant 0 : i32
    %c0_i32_0 = arith.constant 0 : i32
    %c0_i32_1 = arith.constant 0 : i32
    return %c0_i32, %c0_i32_0 : i32, i32
  }
}

</mosaic_0001>

<bundles_post_ra>
// kernel: tpu_custom_call.1
= control target key start
LH: loop header
LB: loop body
LE: loop exit
PB: predicated region body
PF: predicated region fallthrough
CT: control target
= control target key end

     0   :  { %9 = vsyncpa [#allocation3], 0  ;;  %s368_s0 = inlined_call_operand.hbm [shape: f32[8,32], index: 0, kind: input, shape index: {}]   ;;  %s369_s1 = inlined_call_operand.hbm [shape: f32[1,32], index: 1, kind: output, shape index: {0}]   ;;  %s370_s2 = inlined_call_operand.hbm [shape: f32[1,32], index: 2, kind: output, shape index: {1}]   ;;  %s371_s3 = inlined_call_operand.hbm [shape: f32[32,32], index: 3, kind: output, shape index: {2}]  }
   0x1   :  { %10 = vsyncpa [#allocation4], 0 }
   0x2   :  { %11 = vsyncpa [#allocation7], 0  ;;  %s17_s14 = sshll.u32 %s368_s0, 4  ;;  %s315_s15 = smov [#allocation2]   ;;  %s18_s14 = int_to_ptr.hbm [resolvable:$true] %s17_s14 }
   0x3   :  { %s19_s16 = sshll.u32 %s315_s15, 4  ;;  %s20_s16 = int_to_ptr.vmem [resolvable:$true] %s19_s16 }
   0x4   :  { %22 = dma.hbm_to_vmem [thread:$0]  %s18_s14, 128, %s20_s16, [#allocation3]  }
   0x5   :  { %309 = dma.done.wait [#allocation3], 128  }
   0x6   :  { %310 = vsyncadd [#allocation3], 4294967168  ;;  %v39_v0 = vld [vmem:[#allocation2] sm:$0xff]  ;;  %vm34_vm0 = vcmask 261120   ;;  %v316_v1 = vmov 0.0   ;;  %vm99_vm1 = vcmask 64512  }
   0x7   :  { %67 = vxpose.xlu0.b32.start.end [1/1] (short) (narrow) %v39_v0, 32  ;;  %127 = vmatpush.msra.mxu0 %v39_v0  ;;  %35 = vst.msk [vmem:[#allocation8] sm:$0xff] %vm34_vm0, %v316_v1  ;;  %v53_v6 = vmul.f32 %v39_v0, %v39_v0  ;;  %v42_v9 = vsel %vm34_vm0, %v39_v0, 0.0  ;;  %vm31_vm2 = vcmask 253952   ;;  %s317_s0 = smov [#allocation6]   ;;  %s167_s20 = sshll.u32 %s370_s2, 4  ;;  %s168_s20 = int_to_ptr.hbm [resolvable:$true] %s167_s20 }
   0x8   :  { %203 = vmatpush.msra.mxu1 %v39_v0  ;;  %204 = vmatpush.msra.mxu2 %v39_v0  ;;  %36 = vst.msk [vmem:[#allocation8 + $0x8] sm:$0xff] %vm34_vm0, %v316_v1  ;;  %v43_v10 = vrot.slane %v42_v9, 4  ;;  %s165_s17 = sshll.u32 %s317_s0, 4  ;;  %s318_s21 = smov [#allocation5]   ;;  %s166_s17 = int_to_ptr.vmem [resolvable:$true] %s165_s17 }
   0x9   :  { %205 = vmatpush.msra.mxu3 %v39_v0  ;;  %37 = vst.msk [vmem:[#allocation8 + $0x10] sm:$0xff] %vm34_vm0, %v316_v1  ;;  %v54_v7 = vsel %vm34_vm0, %v53_v6, 0.0  ;;  %s154_s22 = sshll.u32 %s318_s21, 4  ;;  %s156_s25 = sshll.u32 %s369_s1, 4  ;;  %s155_s22 = int_to_ptr.vmem [resolvable:$true] %s154_s22  ;;  %s157_s25 = int_to_ptr.hbm [resolvable:$true] %s156_s25 }
   0xa   :  { %38 = vst.msk [vmem:[#allocation8 + $0x18] sm:$0xff] %vm34_vm0, %v316_v1  ;;  %v55_v8 = vrot.slane %v54_v7, 4  ;;  %v44_v12 = vadd.f32 %v43_v10, %v42_v9  ;;  %s319_s1 = smov [#allocation8]   ;;  %s177_s28 = sshll.u32 %s371_s3, 4  ;;  %s178_s28 = int_to_ptr.hbm [resolvable:$true] %s177_s28 }
   0xb   :  { %33 = vst.msk [vmem:[#allocation6] sm:$0x1] %vm31_vm2, %v316_v1  ;;  %s175_s2 = sshll.u32 %s319_s1, 4  ;;  %s320_s29 = smov 128   ;;  %s176_s2 = int_to_ptr.vmem [resolvable:$true] %s175_s2 }
   0xc   :  { %v56_v11 = vadd.f32 %v55_v8, %v54_v7  ;;  %32 = vst.msk [vmem:[#allocation5] sm:$0x1] %vm31_vm2, %v316_v1  ;;  %v45_v14 = vrot.slane %v44_v12, 2  ;;  %s321_s30 = smov 8  }
   0xe   :  { %v57_v13 = vrot.slane %v56_v11, 2  ;;  %v46_v16 = vadd.f32 %v45_v14, %v44_v12  ;;  %v63_v22 = vld [vmem:[#allocation8] sm:$0xff] }
   0xf   :  { %v64_v28 = vld [vmem:[#allocation8 + $0x8] sm:$0xff] }
  0x10   :  { %v58_v15 = vadd.f32 %v57_v13, %v56_v11  ;;  %v47_v18 = vrot.slane %v46_v16, 1  ;;  %v65_v31 = vld [vmem:[#allocation8 + $0x10] sm:$0xff] }
  0x11   :  { %v66_v34 = vld [vmem:[#allocation8 + $0x18] sm:$0xff] }
  0x12   :  { %v59_v17 = vrot.slane %v58_v15, 1  ;;  %v52_v20 = vld [vmem:[#allocation6] sm:$0x1]  ;;  %v48_v21 = vadd.f32 %v47_v18, %v46_v16 }
  0x13   :  { %v40_v24 = vld [vmem:[#allocation5] sm:$0x1] }
  0x14   :  { %v60_v19 = vadd.f32 %v59_v17, %v58_v15  ;;  %v49_v25 = vadd.f32 %v48_v21, %v40_v24 }
  0x16   :  { %v61_v23 = vadd.f32 %v60_v19, %v52_v20  ;;  %51 = vst.msk [vmem:[#allocation5] sm:$0x1] %vm31_vm2, %v49_v25 }
  0x17   :  { %159 = dma.vmem_to_hbm [thread:$0]  %s155_s22, 16, %s157_s25, [#allocation4]  }
  0x18   :  { %62 = vst.msk [vmem:[#allocation6] sm:$0x1] %vm31_vm2, %v61_v23 }
  0x19   :  { %170 = dma.vmem_to_hbm [thread:$0]  %s166_s17, 16, %s168_s20, [#allocation7]  }
  0xab   :  { %v83_v2 = vpop.trf.xlu0 }
  0xac   :  { %199 = vmatmul.msk.f32.vlgmr.msra.gmra.mxu0 %vm99_vm1, %v83_v2 }
  0xb3   :  { %v84_v3 = vpop.trf.xlu0 }
  0xb4   :  { %200 = vmatmul.msk.f32.vlgmr.msra.gmra.mxu1 %vm99_vm1, %v84_v3 }
  0xbb   :  { %v85_v4 = vpop.trf.xlu0 }
  0xbc   :  { %201 = vmatmul.msk.f32.vlgmr.msra.gmra.mxu2 %vm99_vm1, %v85_v4 }
  0xc3   :  { %v86_v5 = vpop.trf.xlu0 }
  0xc4   :  { %202 = vmatmul.msk.f32.vlgmr.msra.gmra.mxu3 %vm99_vm1, %v86_v5 }
 0x129   :  { %v129_v26 = vpop.f32.mrf.mxu0 }
 0x12a   :  { %v141_v27 = vadd.f32 %v129_v26, %v63_v22 }
 0x12c   :  { %145 = vst.msk [vmem:[#allocation8] sm:$0xff] %vm34_vm0, %v141_v27 }
 0x131   :  { %v132_v29 = vpop.f32.mrf.mxu1 }
 0x132   :  { %v142_v30 = vadd.f32 %v132_v29, %v64_v28 }
 0x134   :  { %146 = vst.msk [vmem:[#allocation8 + $0x8] sm:$0xff] %vm34_vm0, %v142_v30 }
 0x13f   :  { %v135_v32 = vpop.f32.mrf.mxu2 }
 0x140   :  { %v143_v33 = vadd.f32 %v135_v32, %v65_v31 }
 0x142   :  { %147 = vst.msk [vmem:[#allocation8 + $0x10] sm:$0xff] %vm34_vm0, %v143_v33 }
 0x147   :  { %v138_v35 = vpop.f32.mrf.mxu3 }
 0x148   :  { %v144_v36 = vadd.f32 %v138_v35, %v66_v34 }
 0x14a   :  { %148 = vst.msk [vmem:[#allocation8 + $0x18] sm:$0xff] %vm34_vm0, %v144_v36 }
 0x14b   :  { %183 = dma.vmem_to_hbm [thread:$0]  %s176_s2, 512, %s178_s28, [#allocation7], %s320_s29, %s320_s29, %s321_s30  }
 0x14c   :  { %311 = dma.done.wait [#allocation4], 16  }
 0x14d   :  { %312 = vsyncadd [#allocation4], 4294967280 }
 0x14e   :  { %313 = dma.done.wait [#allocation7], 528  }
 0x14f   :  { %314 = vsyncadd [#allocation7], 4294966768 }
 0x150   :  { %196 = vsyncpa [#allocation3], 1 }
 0x151   :  { %197 = vsyncpa [#allocation4], 1 }
 0x152   :  { %198 = vsyncpa [#allocation7], 1 }

</bundles_post_ra>
